<compile_context>
chip_gen: v6e
topology: v6e:2x2x1
jax: 0.10.0
libtpu: 0.0.40
codegen_flags: <defaults>
</compile_context>

<pallas_src>
import functools

import jax
import jax.numpy as jnp
import numpy as np
from jax import lax
from jax.experimental import pallas as pl
from jax.experimental.pallas import tpu as pltpu

BN_EPS = 1e-5
VMEM_SPEC = pl.BlockSpec(memory_space=pltpu.MemorySpace.VMEM)


def _round_up(x, m):
    return (x + m - 1) // m * m


# ---------------------------------------------------------------------------
# Kernel 0 (tiny, gridless): weight = softmax(W1.T + b1, axis=0)  == softmax(l1(eye))
# ---------------------------------------------------------------------------
def _softmax_weight_kernel(w1t_ref, b1_ref, w_ref):
    logits = w1t_ref[...] + b1_ref[...]                      # (L, C)
    m = jnp.max(logits, axis=0, keepdims=True)               # (1, C)
    e = jnp.exp(logits - m)
    w_ref[...] = e / jnp.sum(e, axis=0, keepdims=True)       # (L, C)


# ---------------------------------------------------------------------------
# Kernel 1 (phase 1, batch-tiled): y = sum_l x*w  +  per-tile masked BN partial stats
# ---------------------------------------------------------------------------
def _weighted_sum_kernel(x_ref, w_ref, y_ref, psum_ref, pssq_ref, *, batch, tb):
    # x: (TB, L, C) native dtype; w: (L, C) f32
    x = x_ref[...].astype(jnp.float32)
    y = jnp.sum(x * w_ref[...][None, :, :], axis=1)          # (TB, C) f32
    y_ref[...] = y                                           # OOB tail rows are masked on store

    # Mask padded tail rows out of the statistics (garbage in the padded region of the
    # last partial tile must not bias mean/var; use where() so NaN/Inf cannot leak).
    row = pl.program_id(0) * tb + lax.broadcasted_iota(jnp.int32, (tb, 1), 0)
    yv = jnp.where(row < batch, y, 0.0)                      # (TB, C)

    part_sum = jnp.sum(yv, axis=0, keepdims=True)            # (1, C)
    part_ssq = jnp.sum(yv * yv, axis=0, keepdims=True)       # (1, C)
    # Replicate across 8 sublanes so the partial-stats block is a conforming (8, C) tile
    # (phase 2 divides the replicated sum by 8 — exact in fp).
    psum_ref[...] = jnp.broadcast_to(part_sum, (8, part_sum.shape[1]))
    pssq_ref[...] = jnp.broadcast_to(part_ssq, (8, part_ssq.shape[1]))


# ---------------------------------------------------------------------------
# Kernel 2 (phase 2, batch-tiled): merge partial stats -> BatchNorm normalize
# ---------------------------------------------------------------------------
def _bn_apply_kernel(y_ref, psum_ref, pssq_ref, onehot_ref, onehot_t_ref,
                     gamma_c_ref, beta_c_ref, out_ref, *, n_elems):
    # Partials are replicated across 8 sublane rows -> scale by 1/8 after the reduce.
    sum_c = jnp.sum(psum_ref[...], axis=0, keepdims=True) * 0.125      # (1, C)
    ssq_c = jnp.sum(pssq_ref[...], axis=0, keepdims=True) * 0.125      # (1, C)

    # Per-num_nwp-channel (c % N) stats via tiny one-hot matmuls (batch already reduced).
    sum_n = jnp.dot(sum_c, onehot_ref[...], preferred_element_type=jnp.float32)  # (1, N)
    ssq_n = jnp.dot(ssq_c, onehot_ref[...], preferred_element_type=jnp.float32)  # (1, N)
    mean_n = sum_n / n_elems
    var_n = ssq_n / n_elems - mean_n * mean_n                # biased (training-mode BN)
    invstd_n = lax.rsqrt(var_n + BN_EPS)

    # Broadcast N -> C (lane-dense) via one-hot transpose.
    mean_c = jnp.dot(mean_n, onehot_t_ref[...], preferred_element_type=jnp.float32)    # (1, C)
    invstd_c = jnp.dot(invstd_n, onehot_t_ref[...], preferred_element_type=jnp.float32)  # (1, C)
    scale_c = gamma_c_ref[...] * invstd_c

    out_ref[...] = (y_ref[...] - mean_c) * scale_c + beta_c_ref[...]   # (TB, C) lane-dense


# ---------------------------------------------------------------------------
# One-time parameter prep (transposes / broadcasts hoisted off the hot path)
# ---------------------------------------------------------------------------
def prepare_params(W1, b1, gamma, beta, num_nwp):
    # W1: (C, L) nn.Linear weight (out_features, in_features); b1: (C,)
    C = W1.shape[0]
    N = int(num_nwp)
    S = C // N
    n_idx = jnp.arange(C) % N
    onehot = (n_idx[:, None] == jnp.arange(N)[None, :]).astype(jnp.float32)   # (C, N)
    return dict(
        w1t=jnp.asarray(W1, jnp.float32).T,                   # (L, C)
        b1=jnp.asarray(b1, jnp.float32).reshape(1, C),
        onehot=onehot,
        onehot_t=onehot.T,                                    # (N, C)
        gamma_c=jnp.tile(jnp.asarray(gamma, jnp.float32), S).reshape(1, C),   # gamma[c % N]
        beta_c=jnp.tile(jnp.asarray(beta, jnp.float32), S).reshape(1, C),     # beta[c % N]
    )


# ---------------------------------------------------------------------------
# Forward
# ---------------------------------------------------------------------------
def local_conv1d_forward(x, prep, *, tb_max=512):
    B, L, C = x.shape
    N = prep["onehot"].shape[1]
    S = C // N

    # Batch tile: multiple of 8 (f32 sublane), capped for v7x's 64 MiB/TC VMEM.
    tb = min(_round_up(int(tb_max), 8), _round_up(B, 8))
    nb = (B + tb - 1) // tb

    cparams = pltpu.CompilerParams(
        dimension_semantics=("parallel",),          # v7x megacore sharding of the batch grid
        vmem_limit_bytes=32 * 1024 * 1024,
    )

    # --- kernel 0: parameter-only softmax weight (tiny) ---------------------
    w = pl.pallas_call(
        _softmax_weight_kernel,
        out_shape=jax.ShapeDtypeStruct((L, C), jnp.float32),
        in_specs=[VMEM_SPEC, VMEM_SPEC],
        out_specs=VMEM_SPEC,
    )(prep["w1t"], prep["b1"])

    # --- phase 1: weighted sum over local_points + per-tile BN partial stats
    y, psum, pssq = pl.pallas_call(
        functools.partial(_weighted_sum_kernel, batch=B, tb=tb),
        out_shape=(jax.ShapeDtypeStruct((B, C), jnp.float32),
                   jax.ShapeDtypeStruct((nb * 8, C), jnp.float32),
                   jax.ShapeDtypeStruct((nb * 8, C), jnp.float32)),
        grid=(nb,),
        in_specs=[pl.BlockSpec((tb, L, C), lambda i: (i, 0, 0)),
                  pl.BlockSpec((L, C), lambda i: (0, 0))],
        out_specs=(pl.BlockSpec((tb, C), lambda i: (i, 0)),
                   pl.BlockSpec((8, C), lambda i: (i, 0)),
                   pl.BlockSpec((8, C), lambda i: (i, 0))),
        compiler_params=cparams,
        cost_estimate=pl.CostEstimate(
            flops=2 * B * L * C,
            transcendentals=0,
            bytes_accessed=B * L * C * x.dtype.itemsize
                           + (B + 2 * nb * 8) * C * 4 + L * C * 4),
    )(x, w)

    # --- phase 2: merge stats, normalize (re-reads only y; out aliases y) ---
    out2d = pl.pallas_call(
        functools.partial(_bn_apply_kernel, n_elems=float(B * S)),
        out_shape=jax.ShapeDtypeStruct((B, C), jnp.float32),
        grid=(nb,),
        in_specs=[pl.BlockSpec((tb, C), lambda i: (i, 0)),
                  pl.BlockSpec((nb * 8, C), lambda i: (0, 0)),
                  pl.BlockSpec((nb * 8, C), lambda i: (0, 0)),
                  pl.BlockSpec((C, N), lambda i: (0, 0)),
                  pl.BlockSpec((N, C), lambda i: (0, 0)),
                  pl.BlockSpec((1, C), lambda i: (0, 0)),
                  pl.BlockSpec((1, C), lambda i: (0, 0))],
        out_specs=pl.BlockSpec((tb, C), lambda i: (i, 0)),
        input_output_aliases={0: 0},
        compiler_params=cparams,
        cost_estimate=pl.CostEstimate(
            flops=4 * B * C,
            transcendentals=0,
            bytes_accessed=2 * B * C * 4 + 2 * nb * 8 * C * 4),
    )(y, psum, pssq, prep["onehot"], prep["onehot_t"],
      prep["gamma_c"], prep["beta_c"])

    # Cheap wrapper-side view to the PyTorch output layout (B, num_stats, num_nwp).
    return out2d.reshape(B, S, N)


# ---------------------------------------------------------------------------
# Pure-JAX reference mirroring the PyTorch forward (training-mode BatchNorm)
# ---------------------------------------------------------------------------
def local_conv1d_ref(x, W1, b1, gamma, beta, num_nwp, eps=BN_EPS):
    L = x.shape[1]
    weight = jax.nn.softmax(jnp.eye(L, dtype=jnp.float32) @ W1.T + b1, axis=0)  # (L, C)
    y = jnp.sum(x.astype(jnp.float32) * weight[None, :, :], axis=1)             # (B, C)
    B, C = y.shape
    N = int(num_nwp)
    S = C // N
    y3 = y.reshape(B, S, N)
    mean = y3.mean(axis=(0, 1))
    var = ((y3 - mean) ** 2).mean(axis=(0, 1))                                  # biased
    return (y3 - mean) * lax.rsqrt(var + eps) * gamma + beta                    # (B, S, N)


# ---------------------------------------------------------------------------
if __name__ == "__main__":
    key = jax.random.PRNGKey(0)
    ks = jax.random.split(key, 6)

    # Small shapes consistent with the module; C = num_nwp*num_stats = 128 (lane-dense).
    # B=12 with a tile of 8 exercises the multi-step pipelined grid AND the masked
    # partial tail tile.
    B, LOCAL_POINTS, NUM_NWP, NUM_STATS = 12, 16, 8, 16
    C = NUM_NWP * NUM_STATS

    lim1 = 1.0 / np.sqrt(LOCAL_POINTS)
    W1 = jax.random.uniform(ks[0], (C, LOCAL_POINTS), jnp.float32, -lim1, lim1)
    b1 = jax.random.uniform(ks[1], (C,), jnp.float32, -lim1, lim1)
    gamma = jax.random.uniform(ks[2], (NUM_NWP,), jnp.float32, 0.5, 1.5)
    beta = 0.1 * jax.random.normal(ks[3], (NUM_NWP,), jnp.float32)
    x = jax.random.normal(ks[4], (B, LOCAL_POINTS, C), jnp.float32)

    prep = prepare_params(W1, b1, gamma, beta, NUM_NWP)
    fwd = jax.jit(functools.partial(local_conv1d_forward, tb_max=8))
    out = jax.block_until_ready(fwd(x, prep))

    ref = local_conv1d_ref(x, W1, b1, gamma, beta, NUM_NWP)
    assert out.shape == (B, NUM_STATS, NUM_NWP), (out.shape, (B, NUM_STATS, NUM_NWP))
    np.testing.assert_allclose(np.asarray(out), np.asarray(ref), rtol=1e-3, atol=1e-3)
    print("KERNEL_OK")
</pallas_src>

<mosaic_0001>
module attributes {stable_mosaic.version = 11 : i64} {
  func.func @_bn_apply_kernel(%arg0: i32, %arg1: memref<8x128xf32, #tpu.memory_space<vmem>>, %arg2: memref<16x128xf32, #tpu.memory_space<vmem>>, %arg3: memref<16x128xf32, #tpu.memory_space<vmem>>, %arg4: memref<128x8xf32, #tpu.memory_space<vmem>>, %arg5: memref<8x128xf32, #tpu.memory_space<vmem>>, %arg6: memref<1x128xf32, #tpu.memory_space<vmem>>, %arg7: memref<1x128xf32, #tpu.memory_space<vmem>>, %arg8: memref<8x128xf32, #tpu.memory_space<vmem>>) attributes {dimension_semantics = [#tpu.dimension_semantics<parallel>], iteration_bounds = array<i64: 2>, scalar_prefetch = 0 : i64, scratch_operands = 0 : i64, tpu.core_type = #tpu.core_type<tc>, window_params = [{transform_indices = @transform_0, window_bounds = array<i64: 8, 128>}, {pipeline_mode = #tpu.pipeline_mode<synchronous>, transform_indices = @transform_1, window_bounds = array<i64: 16, 128>}, {pipeline_mode = #tpu.pipeline_mode<synchronous>, transform_indices = @transform_2, window_bounds = array<i64: 16, 128>}, {pipeline_mode = #tpu.pipeline_mode<synchronous>, transform_indices = @transform_3, window_bounds = array<i64: 128, 8>}, {pipeline_mode = #tpu.pipeline_mode<synchronous>, transform_indices = @transform_4, window_bounds = array<i64: 8, 128>}, {pipeline_mode = #tpu.pipeline_mode<synchronous>, transform_indices = @transform_5, window_bounds = array<i64: 1, 128>}, {pipeline_mode = #tpu.pipeline_mode<synchronous>, transform_indices = @transform_6, window_bounds = array<i64: 1, 128>}, {transform_indices = @transform_7, window_bounds = array<i64: 8, 128>}]} {
    %c0 = arith.constant 0 : index
    %c0_0 = arith.constant 0 : index
    %0 = vector.load %arg2[%c0, %c0_0] : memref<16x128xf32, #tpu.memory_space<vmem>>, vector<16x128xf32>
    %cst = arith.constant dense<0.000000e+00> : vector<128xf32>
    %1 = vector.multi_reduction <add>, %0, %cst [0] : vector<16x128xf32> to vector<128xf32>
    %2 = vector.shape_cast %1 : vector<128xf32> to vector<1x128xf32>
    %cst_1 = arith.constant 1.250000e-01 : f32
    %3 = vector.broadcast %cst_1 : f32 to vector<1x128xf32>
    %4 = arith.mulf %2, %3 : vector<1x128xf32>
    %c0_2 = arith.constant 0 : index
    %c0_3 = arith.constant 0 : index
    %5 = vector.load %arg3[%c0_2, %c0_3] : memref<16x128xf32, #tpu.memory_space<vmem>>, vector<16x128xf32>
    %cst_4 = arith.constant dense<0.000000e+00> : vector<128xf32>
    %6 = vector.multi_reduction <add>, %5, %cst_4 [0] : vector<16x128xf32> to vector<128xf32>
    %7 = vector.shape_cast %6 : vector<128xf32> to vector<1x128xf32>
    %cst_5 = arith.constant 1.250000e-01 : f32
    %8 = vector.broadcast %cst_5 : f32 to vector<1x128xf32>
    %9 = arith.mulf %7, %8 : vector<1x128xf32>
    %c0_6 = arith.constant 0 : index
    %c0_7 = arith.constant 0 : index
    %10 = vector.load %arg4[%c0_6, %c0_7] : memref<128x8xf32, #tpu.memory_space<vmem>>, vector<128x8xf32>
    %cst_8 = arith.constant dense<0.000000e+00> : vector<1x8xf32>
    %11 = tpu.matmul %4, %10, %cst_8 {dimension_numbers = #tpu.dot_dimension_numbers<[1], [0], [0], [1], [0, 0, 1, 1], [], []>} : vector<1x128xf32>, vector<128x8xf32>, vector<1x8xf32> -> vector<1x8xf32>
    %c0_9 = arith.constant 0 : index
    %c0_10 = arith.constant 0 : index
    %12 = vector.load %arg4[%c0_9, %c0_10] : memref<128x8xf32, #tpu.memory_space<vmem>>, vector<128x8xf32>
    %cst_11 = arith.constant dense<0.000000e+00> : vector<1x8xf32>
    %13 = tpu.matmul %9, %12, %cst_11 {dimension_numbers = #tpu.dot_dimension_numbers<[1], [0], [0], [1], [0, 0, 1, 1], [], []>} : vector<1x128xf32>, vector<128x8xf32>, vector<1x8xf32> -> vector<1x8xf32>
    %cst_12 = arith.constant 1.920000e+02 : f32
    %14 = vector.broadcast %cst_12 : f32 to vector<1x8xf32>
    %15 = arith.divf %11, %14 : vector<1x8xf32>
    %cst_13 = arith.constant 1.920000e+02 : f32
    %16 = vector.broadcast %cst_13 : f32 to vector<1x8xf32>
    %17 = arith.divf %13, %16 : vector<1x8xf32>
    %18 = arith.mulf %15, %15 : vector<1x8xf32>
    %19 = arith.subf %17, %18 : vector<1x8xf32>
    %cst_14 = arith.constant 9.99999974E-6 : f32
    %20 = vector.broadcast %cst_14 : f32 to vector<1x8xf32>
    %21 = arith.addf %19, %20 : vector<1x8xf32>
    %22 = math.rsqrt %21 : vector<1x8xf32>
    %c0_15 = arith.constant 0 : index
    %c0_16 = arith.constant 0 : index
    %23 = vector.load %arg5[%c0_15, %c0_16] : memref<8x128xf32, #tpu.memory_space<vmem>>, vector<8x128xf32>
    %cst_17 = arith.constant dense<0.000000e+00> : vector<1x128xf32>
    %24 = tpu.matmul %15, %23, %cst_17 {dimension_numbers = #tpu.dot_dimension_numbers<[1], [0], [0], [1], [0, 0, 1, 1], [], []>} : vector<1x8xf32>, vector<8x128xf32>, vector<1x128xf32> -> vector<1x128xf32>
    %c0_18 = arith.constant 0 : index
    %c0_19 = arith.constant 0 : index
    %25 = vector.load %arg5[%c0_18, %c0_19] : memref<8x128xf32, #tpu.memory_space<vmem>>, vector<8x128xf32>
    %cst_20 = arith.constant dense<0.000000e+00> : vector<1x128xf32>
    %26 = tpu.matmul %22, %25, %cst_20 {dimension_numbers = #tpu.dot_dimension_numbers<[1], [0], [0], [1], [0, 0, 1, 1], [], []>} : vector<1x8xf32>, vector<8x128xf32>, vector<1x128xf32> -> vector<1x128xf32>
    %c0_21 = arith.constant 0 : index
    %c0_22 = arith.constant 0 : index
    %27 = vector.load %arg6[%c0_21, %c0_22] : memref<1x128xf32, #tpu.memory_space<vmem>>, vector<1x128xf32>
    %28 = arith.mulf %27, %26 : vector<1x128xf32>
    %c0_23 = arith.constant 0 : index
    %c0_24 = arith.constant 0 : index
    %29 = vector.load %arg1[%c0_23, %c0_24] : memref<8x128xf32, #tpu.memory_space<vmem>>, vector<8x128xf32>
    %30 = vector.broadcast %24 : vector<1x128xf32> to vector<8x128xf32>
    %31 = arith.subf %29, %30 : vector<8x128xf32>
    %32 = vector.broadcast %28 : vector<1x128xf32> to vector<8x128xf32>
    %33 = arith.mulf %31, %32 : vector<8x128xf32>
    %c0_25 = arith.constant 0 : index
    %c0_26 = arith.constant 0 : index
    %34 = vector.load %arg7[%c0_25, %c0_26] : memref<1x128xf32, #tpu.memory_space<vmem>>, vector<1x128xf32>
    %35 = vector.broadcast %34 : vector<1x128xf32> to vector<8x128xf32>
    %36 = arith.addf %33, %35 : vector<8x128xf32>
    %c0_27 = arith.constant 0 : index
    %c0_28 = arith.constant 0 : index
    %37 = vector.load %arg8[%c0_27, %c0_28] : memref<8x128xf32, #tpu.memory_space<vmem>>, vector<8x128xf32>
    tpu.vector_store %arg8[%c0_27, %c0_28], %36 {strides = array<i32>} : memref<8x128xf32, #tpu.memory_space<vmem>>, vector<8x128xf32>,
    return
  }
  func.func @transform_0(%arg0: i32) -> (i32, i32) {
    %c0_i32 = arith.constant 0 : i32
    %c0_i32_0 = arith.constant 0 : i32
    return %arg0, %c0_i32 : i32, i32
  }
  func.func @transform_1(%arg0: i32) -> (i32, i32) {
    %c0_i32 = arith.constant 0 : i32
    %c0_i32_0 = arith.constant 0 : i32
    %c0_i32_1 = arith.constant 0 : i32
    return %c0_i32, %c0_i32_0 : i32, i32
  }
  func.func @transform_2(%arg0: i32) -> (i32, i32) {
    %c0_i32 = arith.constant 0 : i32
    %c0_i32_0 = arith.constant 0 : i32
    %c0_i32_1 = arith.constant 0 : i32
    return %c0_i32, %c0_i32_0 : i32, i32
  }
  func.func @transform_3(%arg0: i32) -> (i32, i32) {
    %c0_i32 = arith.constant 0 : i32
    %c0_i32_0 = arith.constant 0 : i32
    %c0_i32_1 = arith.constant 0 : i32
    return %c0_i32, %c0_i32_0 : i32, i32
  }
  func.func @transform_4(%arg0: i32) -> (i32, i32) {
    %c0_i32 = arith.constant 0 : i32
    %c0_i32_0 = arith.constant 0 : i32
    %c0_i32_1 = arith.constant 0 : i32
    return %c0_i32, %c0_i32_0 : i32, i32
  }
  func.func @transform_5(%arg0: i32) -> (i32, i32) {
    %c0_i32 = arith.constant 0 : i32
    %c0_i32_0 = arith.constant 0 : i32
    %c0_i32_1 = arith.constant 0 : i32
    return %c0_i32, %c0_i32_0 : i32, i32
  }
  func.func @transform_6(%arg0: i32) -> (i32, i32) {
    %c0_i32 = arith.constant 0 : i32
    %c0_i32_0 = arith.constant 0 : i32
    %c0_i32_1 = arith.constant 0 : i32
    return %c0_i32, %c0_i32_0 : i32, i32
  }
  func.func @transform_7(%arg0: i32) -> (i32, i32) {
    %c0_i32 = arith.constant 0 : i32
    %c0_i32_0 = arith.constant 0 : i32
    return %arg0, %c0_i32 : i32, i32
  }
}

module attributes {stable_mosaic.version = 11 : i64} {
  func.func @_weighted_sum_kernel(%arg0: i32, %arg1: memref<8x16x128xf32, #tpu.memory_space<vmem>>, %arg2: memref<16x128xf32, #tpu.memory_space<vmem>>, %arg3: memref<8x128xf32, #tpu.memory_space<vmem>>, %arg4: memref<8x128xf32, #tpu.memory_space<vmem>>, %arg5: memref<8x128xf32, #tpu.memory_space<vmem>>) attributes {dimension_semantics = [#tpu.dimension_semantics<parallel>], iteration_bounds = array<i64: 2>, scalar_prefetch = 0 : i64, scratch_operands = 0 : i64, tpu.core_type = #tpu.core_type<tc>, window_params = [{transform_indices = @transform_0, window_bounds = array<i64: 8, 16, 128>}, {pipeline_mode = #tpu.pipeline_mode<synchronous>, transform_indices = @transform_1, window_bounds = array<i64: 16, 128>}, {transform_indices = @transform_2, window_bounds = array<i64: 8, 128>}, {transform_indices = @transform_3, window_bounds = array<i64: 8, 128>}, {transform_indices = @transform_4, window_bounds = array<i64: 8, 128>}]} {
    %c0 = arith.constant 0 : index
    %c0_0 = arith.constant 0 : index
    %c0_1 = arith.constant 0 : index
    %0 = vector.load %arg1[%c0, %c0_0, %c0_1] : memref<8x16x128xf32, #tpu.memory_space<vmem>>, vector<8x16x128xf32>
    %c0_2 = arith.constant 0 : index
    %c0_3 = arith.constant 0 : index
    %1 = vector.load %arg2[%c0_2, %c0_3] : memref<16x128xf32, #tpu.memory_space<vmem>>, vector<16x128xf32>
    %2 = vector.shape_cast %1 : vector<16x128xf32> to vector<1x16x128xf32>
    %3 = vector.broadcast %2 : vector<1x16x128xf32> to vector<8x16x128xf32>
    %4 = arith.mulf %0, %3 : vector<8x16x128xf32>
    %cst = arith.constant dense<0.000000e+00> : vector<8x128xf32>
    %5 = vector.multi_reduction <add>, %4, %cst [1] : vector<8x16x128xf32> to vector<8x128xf32>
    %c0_4 = arith.constant 0 : index
    %c0_5 = arith.constant 0 : index
    %6 = vector.load %arg3[%c0_4, %c0_5] : memref<8x128xf32, #tpu.memory_space<vmem>>, vector<8x128xf32>
    tpu.vector_store %arg3[%c0_4, %c0_5], %5 {strides = array<i32>} : memref<8x128xf32, #tpu.memory_space<vmem>>, vector<8x128xf32>,
    %c8_i32 = arith.constant 8 : i32
    %7 = arith.muli %arg0, %c8_i32 : i32
    %8 = tpu.iota {dimensions = array<i32: 0>} : vector<8x1xi32>
    %9 = vector.broadcast %7 : i32 to vector<8x1xi32>
    %10 = arith.addi %9, %8 : vector<8x1xi32>
    %c12_i32 = arith.constant 12 : i32
    %11 = vector.broadcast %c12_i32 : i32 to vector<8x1xi32>
    %12 = arith.cmpi slt, %10, %11 : vector<8x1xi32>
    %cst_6 = arith.constant 0.000000e+00 : f32
    %13 = vector.shape_cast %12 : vector<8x1xi1> to vector<8x1xi1>
    %14 = vector.broadcast %13 : vector<8x1xi1> to vector<8x128xi1>
    %15 = vector.broadcast %cst_6 : f32 to vector<8x128xf32>
    %16 = arith.select %14, %5, %15 : vector<8x128xi1>, vector<8x128xf32>
    %cst_7 = arith.constant dense<0.000000e+00> : vector<128xf32>
    %17 = vector.multi_reduction <add>, %16, %cst_7 [0] : vector<8x128xf32> to vector<128xf32>
    %18 = vector.shape_cast %17 : vector<128xf32> to vector<1x128xf32>
    %19 = arith.mulf %16, %16 : vector<8x128xf32>
    %cst_8 = arith.constant dense<0.000000e+00> : vector<128xf32>
    %20 = vector.multi_reduction <add>, %19, %cst_8 [0] : vector<8x128xf32> to vector<128xf32>
    %21 = vector.shape_cast %20 : vector<128xf32> to vector<1x128xf32>
    %22 = vector.shape_cast %18 : vector<1x128xf32> to vector<1x128xf32>
    %23 = vector.broadcast %22 : vector<1x128xf32> to vector<8x128xf32>
    %c0_9 = arith.constant 0 : index
    %c0_10 = arith.constant 0 : index
    %24 = vector.load %arg4[%c0_9, %c0_10] : memref<8x128xf32, #tpu.memory_space<vmem>>, vector<8x128xf32>
    tpu.vector_store %arg4[%c0_9, %c0_10], %23 {strides = array<i32>} : memref<8x128xf32, #tpu.memory_space<vmem>>, vector<8x128xf32>,
    %25 = vector.shape_cast %21 : vector<1x128xf32> to vector<1x128xf32>
    %26 = vector.broadcast %25 : vector<1x128xf32> to vector<8x128xf32>
    %c0_11 = arith.constant 0 : index
    %c0_12 = arith.constant 0 : index
    %27 = vector.load %arg5[%c0_11, %c0_12] : memref<8x128xf32, #tpu.memory_space<vmem>>, vector<8x128xf32>
    tpu.vector_store %arg5[%c0_11, %c0_12], %26 {strides = array<i32>} : memref<8x128xf32, #tpu.memory_space<vmem>>, vector<8x128xf32>,
    return
  }
  func.func @transform_0(%arg0: i32) -> (i32, i32, i32) {
    %c0_i32 = arith.constant 0 : i32
    %c0_i32_0 = arith.constant 0 : i32
    %c0_i32_1 = arith.constant 0 : i32
    return %arg0, %c0_i32, %c0_i32_0 : i32, i32, i32
  }
  func.func @transform_1(%arg0: i32) -> (i32, i32) {
    %c0_i32 = arith.constant 0 : i32
    %c0_i32_0 = arith.constant 0 : i32
    %c0_i32_1 = arith.constant 0 : i32
    return %c0_i32, %c0_i32_0 : i32, i32
  }
  func.func @transform_2(%arg0: i32) -> (i32, i32) {
    %c0_i32 = arith.constant 0 : i32
    %c0_i32_0 = arith.constant 0 : i32
    return %arg0, %c0_i32 : i32, i32
  }
  func.func @transform_3(%arg0: i32) -> (i32, i32) {
    %c0_i32 = arith.constant 0 : i32
    %c0_i32_0 = arith.constant 0 : i32
    return %arg0, %c0_i32 : i32, i32
  }
  func.func @transform_4(%arg0: i32) -> (i32, i32) {
    %c0_i32 = arith.constant 0 : i32
    %c0_i32_0 = arith.constant 0 : i32
    return %arg0, %c0_i32 : i32, i32
  }
}

module attributes {stable_mosaic.version = 11 : i64} {
  func.func @_softmax_weight_kernel(%arg0: memref<16x128xf32, #tpu.memory_space<vmem>>, %arg1: memref<1x128xf32, #tpu.memory_space<vmem>>, %arg2: memref<16x128xf32, #tpu.memory_space<vmem>>) attributes {dimension_semantics = [], scalar_prefetch = 0 : i64, scratch_operands = 0 : i64, tpu.core_type = #tpu.core_type<tc>} {
    %c0 = arith.constant 0 : index
    %c0_0 = arith.constant 0 : index
    %0 = vector.load %arg0[%c0, %c0_0] : memref<16x128xf32, #tpu.memory_space<vmem>>, vector<16x128xf32>
    %c0_1 = arith.constant 0 : index
    %c0_2 = arith.constant 0 : index
    %1 = vector.load %arg1[%c0_1, %c0_2] : memref<1x128xf32, #tpu.memory_space<vmem>>, vector<1x128xf32>
    %2 = vector.broadcast %1 : vector<1x128xf32> to vector<16x128xf32>
    %3 = arith.addf %0, %2 : vector<16x128xf32>
    %cst = arith.constant dense<0xFF800000> : vector<128xf32>
    %4 = vector.multi_reduction <maximumf>, %3, %cst [0] : vector<16x128xf32> to vector<128xf32>
    %5 = vector.shape_cast %4 : vector<128xf32> to vector<1x128xf32>
    %6 = vector.broadcast %5 : vector<1x128xf32> to vector<16x128xf32>
    %7 = arith.subf %3, %6 : vector<16x128xf32>
    %8 = math.exp %7 : vector<16x128xf32>
    %cst_3 = arith.constant dense<0.000000e+00> : vector<128xf32>
    %9 = vector.multi_reduction <add>, %8, %cst_3 [0] : vector<16x128xf32> to vector<128xf32>
    %10 = vector.shape_cast %9 : vector<128xf32> to vector<1x128xf32>
    %11 = vector.broadcast %10 : vector<1x128xf32> to vector<16x128xf32>
    %12 = arith.divf %8, %11 : vector<16x128xf32>
    %c0_4 = arith.constant 0 : index
    %c0_5 = arith.constant 0 : index
    %13 = vector.load %arg2[%c0_4, %c0_5] : memref<16x128xf32, #tpu.memory_space<vmem>>, vector<16x128xf32>
    tpu.vector_store %arg2[%c0_4, %c0_5], %12 {strides = array<i32>} : memref<16x128xf32, #tpu.memory_space<vmem>>, vector<16x128xf32>,
    return
  }
}

</mosaic_0001>

<bundles_post_ra>
// kernel: local_conv1d_forward.3
= control target key start
LH: loop header
LB: loop body
LE: loop exit
PB: predicated region body
PF: predicated region fallthrough
CT: control target
= control target key end

     0   :  { %7 = vsyncpa [#allocation3], 0  ;;  %s98_s9 = smov [#allocation2]   ;;  %s128_s0 = inlined_call_operand.hbm [shape: f32[16,128], index: 0, kind: input, shape index: {}]   ;;  %s129_s1 = inlined_call_operand.vmem [shape: f32[1,128], index: 1, kind: input, shape index: {}]   ;;  %s130_s2 = inlined_call_operand.vmem [shape: f32[16,128], index: 2, kind: output, shape index: {}]  }
   0x1   :  { %s13_s10 = sshll.u32 %s98_s9, 4  ;;  %s14_s10 = int_to_ptr.vmem [resolvable:$true] %s13_s10 }
   0x2   :  { %s84_s11 = scalar_lea.vmem %s14_s10, 256  ;;  %p89_p1 = scmp.lt.s32.totalorder %s14_s10, %s14_s10 }
   0x3   :  { %p85_p0 = scmp.ne.s32.totalorder %s14_s10, %s84_s11  ;;  %p90_p2 = scmp.lt.s32.totalorder %s84_s11, %s84_s11 }
   0x5   :  { %p91_p3 = por %p90_p2, %p89_p1 }
   0x7   :  { %p92_p4 = pnand %p91_p3, %p85_p0 }
   0x9   :  { %95 = shalt.err (!%p92_p4)
}
   0xa   :  { %s99_s12 = smov 128   ;;  %s100_s13 = smov 8  }
   0xb   :  { %19 = dma.hbm_to_vmem [thread:$0]  %s128_s0, 256, %s14_s10, [#allocation3], %s99_s12, %s99_s12, %s100_s13  }
   0xc   :  { %96 = dma.done.wait [#allocation3], 256  }
   0xd   :  { %97 = vsyncadd [#allocation3], 4294967040  ;;  %v25_v0 = vld [vmem:[#allocation2] sm:$0xff]  ;;  %v26_v1 = vld [vmem:[#allocation2 + $0x8] sm:$0xff] }
   0xe   :  { %v66_v2 = vld [vmem:[%s129_s1] ss:$0 sm:$0xff] }
   0xf   :  { %v34_v3 = vadd.f32 %v66_v2, %v25_v0  ;;  %v35_v4 = vadd.f32 %v66_v2, %v26_v1 }
  0x11   :  { %v36_v5 = vmax.f32 %v34_v3, %v35_v4 }
  0x13   :  { %v37_v6 = vrot.slane %v36_v5, 4 }
  0x15   :  { %v38_v7 = vmax.f32 %v36_v5, %v37_v6 }
  0x17   :  { %v39_v8 = vrot.slane %v38_v7, 2 }
  0x19   :  { %v40_v9 = vmax.f32 %v38_v7, %v39_v8 }
  0x1b   :  { %v41_v10 = vrot.slane %v40_v9, 1 }
  0x1d   :  { %v42_v11 = vmax.f32 %v40_v9, %v41_v10 }
  0x1f   :  { %v43_v12 = vsub.f32 %v34_v3, %v42_v11  ;;  %v44_v13 = vsub.f32 %v35_v4, %v42_v11 }
  0x21   :  { %v45_v14 = vmul.f32 1.442695, %v43_v12  ;;  %v47_v15 = vmul.f32 1.442695, %v44_v13 }
  0x23   :  { %70 = vpow2.f32 %v45_v14 }
  0x24   :  { %72 = vpow2.f32 %v47_v15 }
  0x30   :  { %v71_v16 = vpop.eup %70 }
  0x31   :  { %v73_v17 = vpop.eup %72 }
  0x32   :  { %v49_v18 = vadd.f32 %v73_v17, %v71_v16 }
  0x34   :  { %v50_v19 = vrot.slane %v49_v18, 4 }
  0x36   :  { %v51_v20 = vadd.f32 %v50_v19, %v49_v18 }
  0x38   :  { %v52_v21 = vrot.slane %v51_v20, 2 }
  0x3a   :  { %v53_v22 = vadd.f32 %v52_v21, %v51_v20 }
  0x3c   :  { %v54_v23 = vrot.slane %v53_v22, 1 }
  0x3e   :  { %v55_v24 = vadd.f32 %v54_v23, %v53_v22 }
  0x40   :  { %74 = vrcp.f32 %v55_v24 }
  0x4d   :  { %v75_v25 = vpop.eup %74 }
  0x4e   :  { %v57_v26 = vmul.f32 %v75_v25, %v71_v16  ;;  %v58_v27 = vmul.f32 %v75_v25, %v73_v17 }
  0x50   :  { %59 = vst [vmem:[%s130_s2] sm:$0xff] %v57_v26  ;;  %60 = vst [vmem:[%s130_s2 + $0x8] sm:$0xff] %v58_v27 }
  0x51   :  { %65 = vsyncpa [#allocation3], 1 }

// kernel: local_conv1d_forward.4
= control target key start
LH: loop header
LB: loop body
LE: loop exit
PB: predicated region body
PF: predicated region fallthrough
CT: control target
= control target key end

     0   :  { %10 = vsyncpa [#allocation3], 0  ;;  %s802_s0 = inlined_call_operand.hbm [shape: f32[12,16,128], index: 0, kind: input, shape index: {}]   ;;  %s803_s1 = inlined_call_operand.vmem [shape: f32[16,128], index: 1, kind: input, shape index: {}]   ;;  %s804_s2 = inlined_call_operand.vmem [shape: f32[12,128], index: 2, kind: output, shape index: {0}]   ;;  %s805_s3 = inlined_call_operand.vmem [shape: f32[16,128], index: 3, kind: output, shape index: {1}]   ;;  %s806_s4 = inlined_call_operand.vmem [shape: f32[16,128], index: 4, kind: output, shape index: {2}]  }
   0x1   :  { %12 = vsyncpa [#allocation3 + $0x1], 0  ;;  %s668_s15 = smov 0   ;;  %s670_s16 = smov 0  }
   0x2   :  { %s672_s17 = smov 0   ;;  %s674_s18 = smov 0  }
   0x3 LB: > { %s687_s19 = sadd.s32 4294967295, %s638_s18   ;;  %s690_s20 = sadd.s32 1, %s638_s18   ;;  %s638_s18 = sphi %s674_s18, %s811_s18   ;;  %s634_s17 = sphi %s672_s17, %s810_s17   ;;  %s630_s16 = sphi %s670_s16, %s809_s16   ;;  %s626_s15 = sphi %s668_s15, %s808_s15  }
   0x4   : > { %s22_s21 = ssub.s32 %s638_s18, %s690_s20  ;;  %s25_s22 = sadd.s32 1, %s634_s17 }
   0x5   : > { %p23_p0 = scmp.eq.s32.totalorder %s22_s21, 0  ;;  %p32_p1 = scmp.ne.s32.totalorder %s634_s17, %s630_s16 }
   0x6   : > { %p33_p2 = scmp.eq.s32.totalorder %s638_s18, 0  ;;  %p38_p3 = scmp.ne.s32.totalorder %s630_s16, %s626_s15 }
   0x7   : > { %s700_s23 = scalar_select %p23_p0, %s634_s17, %s25_s22  }
   0x8   : > { %p34_p4 = por %p33_p2, %p32_p1  ;;  %p39_p5 = scmp.eq.s32.totalorder %s687_s19, 0 }
   0x9   : > { %p519_p7 = scmp.ge.s32.totalorder %s638_s18, 2 }
   0xa   : > { %p703_p6 = por %p39_p5, %p38_p3 }
   0xb   : > { %160 = sbr.rel (%p519_p7) target bundleno = 48 (0x30), region = 20 }
  0x10   : > { %163 = sbr.rel (!%p34_p4) target bundleno = 48 (0x30), region = 24  ;;  %s164_s25 = sand.u32 (%p34_p4), 1, %s634_s17  }
  0x11   : > { %s521_s26 = sshll.u32 (%p34_p4), %s638_s18, 3  ;;  %s520_s27 = sshll.u32 (%p34_p4), %s164_s25, 7 }
  0x12   : > { %s170_s28 = ssub.s32 (%p34_p4), 12, %s521_s26  ;;  %s713_s5 = scalar_lea.sflag (%p34_p4), [#allocation3], %s164_s25 }
  0x13   : > { %p171_p8 = scmp.lt.s32.totalorder (%p34_p4), %s170_s28, 8  ;;  %s168_s6 = scalar_lea.vmem (%p34_p4), [#allocation2], %s520_s27 }
  0x15   : > { %s813_s28 = smov (!%p171_p8, %s170_s28), 8 }
  0x16   : > { %s710_s29 = sshll.u32 %s813_s28, 8 }
  0x17   : > { %s176_s30 = ssub.s32 2048, %s710_s29 }
  0x18   : > { %177 = vsyncadd %s713_s5, %s176_s30  ;;  %p524_p9 = scmp.ne.s32.totalorder %s710_s29, 0  ;;  %s540_s7 = sshll.u32 %s638_s18, 11 }
  0x19   : > { %s721_s10 = scalar_lea.hbm %s802_s0, %s540_s7  ;;  %s184_s11 = sshll.u32 %s168_s6, 4  ;;  %s723_s11 = int_to_ptr.vmem [resolvable:$true] %s184_s11 }
  0x1a   : > { %s578_s12 = scalar_lea.hbm %s721_s10, %s710_s29  ;;  %s582_s15 = scalar_lea.hbm %s802_s0, 3072 }
  0x1b   : > { %p579_p10 = scmp.ne.s32.totalorder %s721_s10, %s578_s12  ;;  %p583_p13 = scmp.lt.s32.totalorder %s721_s10, %s802_s0 }
  0x1c   : > { %p584_p0 = scmp.lt.s32.totalorder %s582_s15, %s578_s12 }
  0x1d   : > { %p580_p11 = pnand %p579_p10, %p524_p9 }
  0x1e   : > { %p585_p1 = por %p584_p0, %p583_p13 }
  0x1f   : > { %p581_p12 = pneg %p580_p11 }
  0x21   : > { %p586_p2 = pnand %p585_p1, %p581_p12 }
  0x23   : > { %589 = shalt.err (!%p586_p2)
}
  0x24   : > { %s590_s25 = scalar_lea.vmem %s723_s11, %s710_s29  ;;  %s640_s26 = smov [#allocation2]  }
  0x25   : > { %p591_p3 = scmp.ne.s32.totalorder %s723_s11, %s590_s25  ;;  %s594_s27 = sshll.u32 %s640_s26, 4  ;;  %s595_s27 = int_to_ptr.vmem [resolvable:$false] %s594_s27 }
  0x26   : > { %s596_s28 = scalar_lea.vmem %s595_s27, 4096  ;;  %p597_p7 = scmp.lt.s32.totalorder %s723_s11, %s595_s27 }
  0x27   : > { %p592_p4 = pnand %p591_p3, %p524_p9  ;;  %p598_p8 = scmp.lt.s32.totalorder %s596_s28, %s590_s25 }
  0x29   : > { %p593_p5 = pneg %p592_p4  ;;  %p599_p10 = por %p598_p8, %p597_p7 }
  0x2b   : > { %p600_p11 = pnand %p599_p10, %p593_p5 }
  0x2d   : > { %603 = shalt.err (!%p600_p11)
}
  0x2e   : > { %s641_s30 = smov 128   ;;  %s642_s6 = smov 8  }
  0x2f   : > { %190 = dma.hbm_to_vmem [thread:$0]  (%p524_p9), %s721_s10, %s710_s29, %s723_s11, %s713_s5, %s641_s30, %s641_s30, %s642_s6  }
  0x30 PF: > { %p530_p12 = scmp.ge.s32.totalorder %s638_s18, 1  ;;  %p192_p13 = scmp.lt.s32.totalorder %s638_s18, 3 }
  0x32   : > { %p193_p0 = pnand %p530_p12, %p192_p13 }
  0x33   : > { %s198_s7 = sand.u32 (!%p193_p0), 1, %s630_s16  }
  0x34   : > { %196 = sbr.rel (%p193_p0) target bundleno = 104 (0x68), region = 28  ;;  %s531_s8 = sshll.u32 (!%p193_p0), %s198_s7, 7 }
  0x35   : > { %s199_s9 = scalar_lea.sflag (!%p193_p0), [#allocation3], %s198_s7  ;;  %s202_s12 = scalar_lea.vmem (!%p193_p0), [#allocation2], %s531_s8 }
  0x39   : > { %621 = dma.done.wait (%p703_p6), %s199_s9, 2048  }
  0x3a   : > { %623 = vsyncadd (%p703_p6), %s199_s9, 4294965248  ;;  %v252_v0 = vld [vmem:[%s202_s12] sm:$0xff]  ;;  %v253_v1 = vld [vmem:[%s202_s12 + $0x8] sm:$0xff]  ;;  %v367_v3 = vlaneseq  ;;  %s535_s18 = sshll.u32 %s687_s19, 3  ;;  %vm350_vm0 = vcmask 1041409   ;;  %vm352_vm1 = vcmask 1042434  }
  0x3b   : > { %v254_v2 = vld [vmem:[%s202_s12 + $0x10] sm:$0xff]  ;;  %v255_v4 = vld [vmem:[%s202_s12 + $0x18] sm:$0xff]  ;;  %v256_v5 = vld [vmem:[%s202_s12 + $0x20] sm:$0xff]  ;;  %v765_v17 = vstv %s535_s18  ;;  %p240_p6 = scmp.lt.s32.totalorder %s687_s19, 1  ;;  %vm354_vm2 = vcmask 1043459   ;;  %vm356_vm3 = vcmask 1044484  }
  0x3c   : > { %v257_v6 = vld [vmem:[%s202_s12 + $0x28] sm:$0xff]  ;;  %v258_v7 = vld [vmem:[%s202_s12 + $0x30] sm:$0xff]  ;;  %v259_v8 = vld [vmem:[%s202_s12 + $0x38] sm:$0xff]  ;;  %v763_v16 = vshrl.u32 %v367_v3, 7  ;;  %vm358_vm4 = vcmask 1045509   ;;  %vm360_vm5 = vcmask 1046534  }
  0x3d   : > { %v260_v9 = vld [vmem:[%s202_s12 + $0x40] sm:$0xff]  ;;  %v261_v10 = vld [vmem:[%s202_s12 + $0x48] sm:$0xff]  ;;  %v262_v11 = vld [vmem:[%s202_s12 + $0x50] sm:$0xff]  ;;  %s815_s19 = smov (!%p240_p6, %s687_s19), 1  ;;  %vm362_vm6 = vcmask 1047559  }
  0x3e   : > { %v263_v12 = vld [vmem:[%s202_s12 + $0x58] sm:$0xff]  ;;  %v264_v13 = vld [vmem:[%s202_s12 + $0x60] sm:$0xff]  ;;  %v269_v15 = vld [vmem:[%s803_s1 + $0x8] sm:$0xff]  ;;  %s774_s11 = sshll.u32 %s815_s19, 3 }
  0x3f   : > { %v268_v14 = vld [vmem:[%s803_s1] sm:$0xff]  ;;  %v265_v18 = vld [vmem:[%s202_s12 + $0x68] sm:$0xff]  ;;  %v266_v19 = vld [vmem:[%s202_s12 + $0x70] sm:$0xff]  ;;  %v271_v22 = vmul.f32 %v269_v15, %v253_v1  ;;  %v273_v24 = vmul.f32 %v269_v15, %v255_v4  ;;  %v275_v26 = vmul.f32 %v269_v15, %v257_v6  ;;  %v277_v28 = vmul.f32 %v269_v15, %v259_v8  ;;  %s243_s15 = scalar_lea.vmem %s804_s2, %s774_s11  ;;  %s247_s22 = scalar_lea.vmem %s805_s3, %s774_s11 }
  0x40   : > { %v267_v20 = vld [vmem:[%s202_s12 + $0x78] sm:$0xff]  ;;  %v270_v21 = vmul.f32 %v268_v14, %v252_v0  ;;  %v272_v23 = vmul.f32 %v268_v14, %v254_v2  ;;  %v274_v25 = vmul.f32 %v268_v14, %v256_v5  ;;  %v276_v27 = vmul.f32 %v268_v14, %v258_v7  ;;  %s251_s27 = scalar_lea.vmem %s806_s4, %s774_s11 }
  0x41   : > { %v278_v29 = vmul.f32 %v268_v14, %v260_v9  ;;  %v279_v30 = vmul.f32 %v269_v15, %v261_v10  ;;  %v280_v31 = vmul.f32 %v268_v14, %v262_v11  ;;  %v281_v32 = vmul.f32 %v269_v15, %v263_v12 }
  0x42   : > { %v282_v33 = vmul.f32 %v268_v14, %v264_v13  ;;  %v283_v34 = vmul.f32 %v269_v15, %v265_v18  ;;  %v284_v35 = vmul.f32 %v268_v14, %v266_v19  ;;  %v285_v36 = vmul.f32 %v269_v15, %v267_v20 }
  0x43   : > { %v286_v37 = vadd.f32 %v271_v22, %v270_v21  ;;  %v293_v38 = vadd.f32 %v273_v24, %v272_v23  ;;  %v300_v39 = vadd.f32 %v275_v26, %v274_v25  ;;  %v307_v40 = vadd.f32 %v277_v28, %v276_v27 }
  0x44   : > { %v314_v41 = vadd.f32 %v279_v30, %v278_v29  ;;  %v321_v42 = vadd.f32 %v281_v32, %v280_v31  ;;  %v328_v43 = vadd.f32 %v283_v34, %v282_v33  ;;  %v335_v44 = vadd.f32 %v285_v36, %v284_v35 }
  0x45   : > { %v287_v45 = vrot.slane %v286_v37, 4  ;;  %v294_v46 = vrot.slane %v293_v38, 4  ;;  %v301_v47 = vrot.slane %v300_v39, 4  ;;  %v308_v48 = vrot.slane %v307_v40, 4 }
  0x46   : > { %v315_v49 = vrot.slane %v314_v41, 4  ;;  %v322_v50 = vrot.slane %v321_v42, 4  ;;  %v329_v51 = vrot.slane %v328_v43, 4  ;;  %v336_v52 = vrot.slane %v335_v44, 4 }
  0x47   : > { %v288_v53 = vadd.f32 %v287_v45, %v286_v37  ;;  %v295_v54 = vadd.f32 %v294_v46, %v293_v38  ;;  %v302_v55 = vadd.f32 %v301_v47, %v300_v39  ;;  %v309_v56 = vadd.f32 %v308_v48, %v307_v40 }
  0x48   : > { %v316_v57 = vadd.f32 %v315_v49, %v314_v41  ;;  %v323_v58 = vadd.f32 %v322_v50, %v321_v42  ;;  %v330_v59 = vadd.f32 %v329_v51, %v328_v43  ;;  %v337_v60 = vadd.f32 %v336_v52, %v335_v44 }
  0x49   : > { %v289_v61 = vrot.slane %v288_v53, 2  ;;  %v296_v62 = vrot.slane %v295_v54, 2  ;;  %v303_v63 = vrot.slane %v302_v55, 2  ;;  %v310_v0 = vrot.slane %v309_v56, 2 }
  0x4a   : > { %v317_v1 = vrot.slane %v316_v57, 2  ;;  %v324_v2 = vrot.slane %v323_v58, 2  ;;  %v331_v3 = vrot.slane %v330_v59, 2  ;;  %v338_v4 = vrot.slane %v337_v60, 2 }
  0x4b   : > { %v290_v5 = vadd.f32 %v289_v61, %v288_v53  ;;  %v297_v6 = vadd.f32 %v296_v62, %v295_v54  ;;  %v304_v7 = vadd.f32 %v303_v63, %v302_v55  ;;  %v311_v8 = vadd.f32 %v310_v0, %v309_v56 }
  0x4c   : > { %v318_v9 = vadd.f32 %v317_v1, %v316_v57  ;;  %v325_v10 = vadd.f32 %v324_v2, %v323_v58  ;;  %v332_v11 = vadd.f32 %v331_v3, %v330_v59  ;;  %v339_v12 = vadd.f32 %v338_v4, %v337_v60 }
  0x4d   : > { %v291_v13 = vrot.slane %v290_v5, 1  ;;  %v298_v14 = vrot.slane %v297_v6, 1  ;;  %v305_v15 = vrot.slane %v304_v7, 1  ;;  %v312_v18 = vrot.slane %v311_v8, 1 }
  0x4e   : > { %v319_v19 = vrot.slane %v318_v9, 1  ;;  %v326_v20 = vrot.slane %v325_v10, 1  ;;  %v333_v21 = vrot.slane %v332_v11, 1  ;;  %v340_v22 = vrot.slane %v339_v12, 1 }
  0x4f   : > { %v292_v23 = vadd.f32 %v291_v13, %v290_v5  ;;  %v299_v24 = vadd.f32 %v298_v14, %v297_v6  ;;  %v306_v25 = vadd.f32 %v305_v15, %v304_v7  ;;  %v313_v26 = vadd.f32 %v312_v18, %v311_v8 }
  0x50   : > { %v320_v27 = vadd.f32 %v319_v19, %v318_v9  ;;  %v327_v28 = vadd.f32 %v326_v20, %v325_v10  ;;  %v370_v30 = vadd.s32 %v765_v17, %v763_v16  ;;  %v334_v31 = vadd.f32 %v333_v21, %v332_v11 }
  0x51   : > { %v351_v29 = vsel %vm350_vm0, %v299_v24, %v292_v23  ;;  %v341_v33 = vadd.f32 %v340_v22, %v339_v12 }
  0x52   : > { %v353_v32 = vsel %vm352_vm1, %v306_v25, %v351_v29  ;;  %vm371_vm7 = vcmp.lt.s32.totalorder %v370_v30, 12 }
  0x53   : > { %v355_v34 = vsel %vm354_vm2, %v313_v26, %v353_v32 }
  0x54   : > { %v357_v35 = vsel %vm356_vm3, %v320_v27, %v355_v34 }
  0x55   : > { %v359_v36 = vsel %vm358_vm4, %v327_v28, %v357_v35 }
  0x56   : > { %v361_v16 = vsel %vm360_vm5, %v334_v31, %v359_v36 }
  0x57   : > { %v363_v17 = vsel %vm362_vm6, %v341_v33, %v361_v16 }
  0x58   : > { %365 = vst [vmem:[%s243_s15] sm:$0xff] %v363_v17  ;;  %v374_v37 = vsel %vm371_vm7, %v363_v17, 0.0 }
  0x59   : > { %v375_v38 = vrot.slane %v374_v37, 4  ;;  %v381_v39 = vmul.f32 %v374_v37, %v374_v37 }
  0x5b   : > { %v376_v40 = vadd.f32 %v375_v38, %v374_v37  ;;  %v382_v41 = vrot.slane %v381_v39, 4 }
  0x5d   : > { %v377_v42 = vrot.slane %v376_v40, 2  ;;  %v383_v43 = vadd.f32 %v382_v41, %v381_v39 }
  0x5f   : > { %v378_v44 = vadd.f32 %v377_v42, %v376_v40  ;;  %v384_v45 = vrot.slane %v383_v43, 2 }
  0x61   : > { %v379_v46 = vrot.slane %v378_v44, 1  ;;  %v385_v47 = vadd.f32 %v384_v45, %v383_v43 }
  0x63   : > { %v380_v48 = vadd.f32 %v379_v46, %v378_v44  ;;  %v386_v49 = vrot.slane %v385_v47, 1 }
  0x65   : > { %388 = vst [vmem:[%s247_s22] sm:$0xff] %v380_v48  ;;  %v387_v50 = vadd.f32 %v386_v49, %v385_v47 }
  0x67   : > { %389 = vst [vmem:[%s251_s27] sm:$0xff] %v387_v50 }
  0x68 PF: > { %p15_p9 = scmp.ge.s32.totalorder %s690_s20, 4   ;;  %s808_s15 = smov %s630_s16 }
  0x69   : > { %s809_s16 = smov %s634_s17  ;;  %s810_s17 = smov %s700_s23 }
  0x6a   : > { %s811_s18 = smov %s690_s20  ;;  %17 = sbr.rel (!%p15_p9) target bundleno = 3 (0x3), region = 92 }
  0x6f   :  { %437 = vsyncpa [#allocation3], 1 }
  0x70   :  { %439 = vsyncpa [#allocation3 + $0x1], 1 }

// kernel: local_conv1d_forward.5
= control target key start
LH: loop header
LB: loop body
LE: loop exit
PB: predicated region body
PF: predicated region fallthrough
CT: control target
= control target key end

     0   :  { %s874_s24 = smov 0   ;;  %s1002_s0 = inlined_call_operand.vmem [shape: f32[12,128], index: 0, kind: input, shape index: {}, may-alias: {0,7}]   ;;  %s1003_s1 = inlined_call_operand.vmem [shape: f32[16,128], index: 1, kind: input, shape index: {}]   ;;  %s1004_s2 = inlined_call_operand.vmem [shape: f32[16,128], index: 2, kind: input, shape index: {}]   ;;  %s1005_s3 = inlined_call_operand.vmem [shape: f32[128,8], index: 3, kind: input, shape index: {}]   ;;  %s1006_s4 = inlined_call_operand.vmem [shape: f32[8,128], index: 4, kind: input, shape index: {}]   ;;  %s1007_s5 = inlined_call_operand.vmem [shape: f32[1,128], index: 5, kind: input, shape index: {}]   ;;  %s1008_s6 = inlined_call_operand.vmem [shape: f32[1,128], index: 6, kind: input, shape index: {}]   ;;  %s1009_s7 = inlined_call_operand.vmem [shape: f32[12,128], index: 7, kind: output, shape index: {}, may-alias: {0,7}]  }
   0x1 LB: > { %s682_s25 = sadd.s32 4294967295, %s830_s24   ;;  %p686_p0 = scmp.ge.s32.totalorder %s830_s24, 1  ;;  %s830_s24 = sphi %s874_s24, %s17_s24  }
   0x2   : > { %p236_p1 = scmp.lt.s32.totalorder %s830_s24, 3 }
   0x4   : > { %p237_p2 = pnand %p686_p0, %p236_p1 }
   0x5   : > { %p266_p3 = scmp.lt.s32.totalorder (!%p237_p2), %s682_s25, 1 }
   0x6   : > { %240 = sbr.rel (%p237_p2) target bundleno = 462 (0x1ce), region = 48 }
   0xb   : > { %v309_v0 = vld [vmem:[%s1005_s3 + $0x78] sm:$0xff]  ;;  %v832_v1 = vmov 0.0   ;;  %v308_v2 = vld [vmem:[%s1005_s3 + $0x70] sm:$0xff]  ;;  %v307_v3 = vld [vmem:[%s1005_s3 + $0x68] sm:$0xff]  ;;  %vm833_vm0 = vmmov 0   ;;  %vm458_vm1 = vcmask 64512   ;;  %v608_v50 = vlaneseq }
   0xc   : > { %732 = vmatprep.subr.mxu0 %v832_v1  ;;  %767 = vmatprep.subr.mxu1 %v832_v1  ;;  %v306_v4 = vld [vmem:[%s1005_s3 + $0x60] sm:$0xff]  ;;  %v275_v6 = vld [vmem:[%s1003_s1 + $0x8] sm:$0xff]  ;;  %v305_v10 = vld [vmem:[%s1005_s3 + $0x58] sm:$0xff]  ;;  %s1011_s25 = smov (!%p266_p3, %s682_s25), 1 }
   0xd   : > { %733 = vmatpush3.msra.mxu0 %v309_v0  ;;  %768 = vmatpush3.msra.mxu1 %v309_v0  ;;  %v274_v5 = vld [vmem:[%s1003_s1] sm:$0xff]  ;;  %v285_v9 = vld [vmem:[%s1004_s2 + $0x8] sm:$0xff]  ;;  %v304_v13 = vld [vmem:[%s1005_s3 + $0x50] sm:$0xff]  ;;  %v609_v51 = vshrl.u32 %v608_v50, 7  ;;  %s687_s26 = sshll.u32 %s1011_s25, 3 }
   0xe   : > { %734 = vmatprep.subr.mxu0 %v832_v1  ;;  %769 = vmatprep.subr.mxu1 %v832_v1  ;;  %v276_v7 = vadd.f32 %v275_v6, %v274_v5  ;;  %v284_v8 = vld [vmem:[%s1004_s2] sm:$0xff]  ;;  %v303_v16 = vld [vmem:[%s1005_s3 + $0x48] sm:$0xff]  ;;  %v301_v21 = vld [vmem:[%s1005_s3 + $0x38] sm:$0xff]  ;;  %s269_s29 = scalar_lea.vmem %s1002_s0, %s687_s26  ;;  %s273_s12 = scalar_lea.vmem %s1009_s7, %s687_s26 }
   0xf   : > { %735 = vmatpush3.msra.mxu0 %v308_v2  ;;  %770 = vmatpush3.msra.mxu1 %v308_v2  ;;  %v286_v11 = vadd.f32 %v285_v9, %v284_v8  ;;  %v302_v18 = vld [vmem:[%s1005_s3 + $0x40] sm:$0xff]  ;;  %v300_v22 = vld [vmem:[%s1005_s3 + $0x30] sm:$0xff]  ;;  %v299_v25 = vld [vmem:[%s1005_s3 + $0x28] sm:$0xff]  ;;  %v610_v52 = vsub.s32 0, %v609_v51 }
  0x10   : > { %736 = vmatprep.subr.mxu0 %v832_v1  ;;  %771 = vmatprep.subr.mxu1 %v832_v1  ;;  %v277_v12 = vrot.slane %v276_v7, 4  ;;  %v298_v26 = vld [vmem:[%s1005_s3 + $0x20] sm:$0xff]  ;;  %v297_v29 = vld [vmem:[%s1005_s3 + $0x18] sm:$0xff]  ;;  %v296_v30 = vld [vmem:[%s1005_s3 + $0x10] sm:$0xff] }
  0x11   : > { %737 = vmatpush3.msra.mxu0 %v307_v3  ;;  %772 = vmatpush3.msra.mxu1 %v307_v3  ;;  %v287_v14 = vrot.slane %v286_v11, 4  ;;  %v295_v33 = vld [vmem:[%s1005_s3 + $0x8] sm:$0xff]  ;;  %v294_v34 = vld [vmem:[%s1005_s3] sm:$0xff] }
  0x12   : > { %738 = vmatprep.subr.mxu0 %v832_v1  ;;  %773 = vmatprep.subr.mxu1 %v832_v1  ;;  %v278_v15 = vadd.f32 %v277_v12, %v276_v7  ;;  %v457_v37 = vld [vmem:[%s1006_s4] sm:$0xff] }
  0x13   : > { %739 = vmatpush3.msra.mxu0 %v306_v4  ;;  %774 = vmatpush3.msra.mxu1 %v306_v4  ;;  %v288_v17 = vadd.f32 %v287_v14, %v286_v11  ;;  %v605_v53 = vld [vmem:[%s1007_s5] sm:$0x1] }
  0x14   : > { %740 = vmatprep.subr.mxu0 %v832_v1  ;;  %775 = vmatprep.subr.mxu1 %v832_v1  ;;  %v279_v19 = vrot.slane %v278_v15, 2  ;;  %v607_v55 = vld [vmem:[%s269_s29] sm:$0xff] }
  0x15   : > { %741 = vmatpush3.msra.mxu0 %v305_v10  ;;  %776 = vmatpush3.msra.mxu1 %v305_v10  ;;  %v289_v20 = vrot.slane %v288_v17, 2  ;;  %v691_v61 = vld [vmem:[%s1008_s6] ss:$0 sm:$0xff] }
  0x16   : > { %742 = vmatprep.subr.mxu0 %v832_v1  ;;  %777 = vmatprep.subr.mxu1 %v832_v1  ;;  %v280_v23 = vadd.f32 %v279_v19, %v278_v15 }
  0x17   : > { %743 = vmatpush3.msra.mxu0 %v304_v13  ;;  %778 = vmatpush3.msra.mxu1 %v304_v13  ;;  %v290_v24 = vadd.f32 %v289_v20, %v288_v17 }
  0x18   : > { %744 = vmatprep.subr.mxu0 %v832_v1  ;;  %779 = vmatprep.subr.mxu1 %v832_v1  ;;  %v281_v27 = vrot.slane %v280_v23, 1 }
  0x19   : > { %745 = vmatpush3.msra.mxu0 %v303_v16  ;;  %780 = vmatpush3.msra.mxu1 %v303_v16  ;;  %v291_v28 = vrot.slane %v290_v24, 1 }
  0x1a   : > { %746 = vmatprep.subr.mxu0 %v832_v1  ;;  %781 = vmatprep.subr.mxu1 %v832_v1  ;;  %v282_v31 = vadd.f32 %v281_v27, %v280_v23 }
  0x1b   : > { %747 = vmatpush3.msra.mxu0 %v302_v18  ;;  %782 = vmatpush3.msra.mxu1 %v302_v18  ;;  %v292_v32 = vadd.f32 %v291_v28, %v290_v24 }
  0x1c   : > { %748 = vmatprep.subr.mxu0 %v832_v1  ;;  %783 = vmatprep.subr.mxu1 %v832_v1  ;;  %v283_v35 = vmul.f32 0.125, %v282_v31 }
  0x1d   : > { %749 = vmatpush3.msra.mxu0 %v301_v21  ;;  %784 = vmatpush3.msra.mxu1 %v301_v21  ;;  %v293_v36 = vmul.f32 0.125, %v292_v32 }
  0x1e   : > { %750 = vmatprep.subr.mxu0 %v832_v1  ;;  %785 = vmatprep.subr.mxu1 %v832_v1 }
  0x1f   : > { %751 = vmatpush3.msra.mxu0 %v300_v22  ;;  %786 = vmatpush3.msra.mxu1 %v300_v22 }
  0x20   : > { %752 = vmatprep.subr.mxu0 %v832_v1  ;;  %787 = vmatprep.subr.mxu1 %v832_v1 }
  0x21   : > { %753 = vmatpush3.msra.mxu0 %v299_v25  ;;  %788 = vmatpush3.msra.mxu1 %v299_v25 }
  0x22   : > { %754 = vmatprep.subr.mxu0 %v832_v1  ;;  %789 = vmatprep.subr.mxu1 %v832_v1 }
  0x23   : > { %755 = vmatpush3.msra.mxu0 %v298_v26  ;;  %790 = vmatpush3.msra.mxu1 %v298_v26 }
  0x24   : > { %756 = vmatprep.subr.mxu0 %v832_v1  ;;  %791 = vmatprep.subr.mxu1 %v832_v1 }
  0x25   : > { %757 = vmatpush3.msra.mxu0 %v297_v29  ;;  %792 = vmatpush3.msra.mxu1 %v297_v29 }
  0x26   : > { %758 = vmatprep.subr.mxu0 %v832_v1  ;;  %793 = vmatprep.subr.mxu1 %v832_v1 }
  0x27   : > { %759 = vmatpush3.msra.mxu0 %v296_v30  ;;  %794 = vmatpush3.msra.mxu1 %v296_v30 }
  0x28   : > { %760 = vmatprep.subr.mxu0 %v832_v1  ;;  %795 = vmatprep.subr.mxu1 %v832_v1 }
  0x29   : > { %761 = vmatpush3.msra.mxu0 %v295_v33  ;;  %796 = vmatpush3.msra.mxu1 %v295_v33 }
  0x2a   : > { %762 = vmatprep.subr.mxu0 %v832_v1  ;;  %797 = vmatprep.subr.mxu1 %v832_v1 }
  0x2b   : > { %763 = vmatpush3.msra.mxu0 %v294_v34  ;;  %764 = vmatprep.mubr.msk.f32.mxu0 %vm833_vm0, %v832_v1 }
  0x2c   : > { %798 = vmatpush3.msra.mxu1 %v294_v34  ;;  %799 = vmatprep.mubr.msk.f32.mxu1 %vm833_vm0, %v832_v1 }
  0x2d   : > { %765 = vmatmul.mubr.f32.vlgmr.msra.gmra.mxu0 %v283_v35  ;;  %800 = vmatmul.mubr.f32.vlgmr.msra.gmra.mxu1 %v293_v36 }
  0x2e   : > { %802 = vmatprep.subr.mxu0 %v832_v1  ;;  %804 = vmatprep.mubr.msk.f32.mxu0 %vm833_vm0, %v832_v1 }
  0x2f   : > { %807 = vmatprep.subr.mxu1 %v832_v1  ;;  %809 = vmatprep.mubr.msk.f32.mxu1 %vm833_vm0, %v832_v1 }
  0x30   : > { %803 = vmatpush3.msra.mxu0 %v457_v37  ;;  %808 = vmatpush3.msra.mxu1 %v457_v37 }
  0xed   : > { %v376_v38 = vpop.f32.mrf.mxu0  ;;  %v446_v39 = vpop.f32.mrf.mxu1 }
  0xee   : > { %v451_v40 = vmul.f32 0.0052083335, %v376_v38  ;;  %v452_v41 = vmul.f32 0.0052083335, %v446_v39 }
  0xef   : > { %v766_v42 = vpop.f32.mrf.mxu0  ;;  %v801_v43 = vpop.f32.mrf.mxu1 }
  0xf0   : > { %v453_v44 = vmul.f32 %v451_v40, %v451_v40  ;;  %805 = vmatmul.mubr.msk.f32.vlgmr.msra.gmra.mxu0 %vm458_vm1, %v451_v40 }
  0xf2   : > { %v454_v45 = vsub.f32 %v452_v41, %v453_v44 }
  0xf4   : > { %v455_v46 = vadd.f32 1e-05, %v454_v45 }
  0xf6   : > { %822 = vrsqrt.f32 %v455_v46 }
 0x103   : > { %v823_v47 = vpop.eup %822 }
 0x104   : > { %810 = vmatmul.mubr.msk.f32.vlgmr.msra.gmra.mxu1 %vm458_vm1, %v823_v47 }
 0x1b0   : > { %v528_v48 = vpop.f32.mrf.mxu0 }
 0x1b1   : > { %v611_v54 = vrot.slane %v528_v48, %v610_v52 }
 0x1b2   : > { %v806_v49 = vpop.f32.mrf.mxu0 }
 0x1b3   : > { %v612_v59 = vsub.f32 %v607_v55, %v611_v54 }
 0x1c4   : > { %v601_v56 = vpop.f32.mrf.mxu1 }
 0x1c5   : > { %v606_v57 = vmul.f32 %v605_v53, %v601_v56 }
 0x1c6   : > { %v811_v58 = vpop.f32.mrf.mxu1 }
 0x1c7   : > { %v617_v60 = vrot.slane %v606_v57, %v610_v52 }
 0x1c9   : > { %v619_v62 = vmul.f32 %v617_v60, %v612_v59 }
 0x1cb   : > { %v627_v63 = vadd.f32 %v691_v61, %v619_v62 }
 0x1cd   : > { %628 = vst [vmem:[%s273_s12] sm:$0xff] %v627_v63 }
 0x1ce PF: > { %s17_s24 = sadd.s32 1, %s830_s24  }
 0x1cf   : > { %p14_p4 = scmp.ge.s32.totalorder %s17_s24, 4  }
 0x1d1   :  { %16 = sbr.rel (!%p14_p4) target bundleno = 1 (0x1), region = 78 }

</bundles_post_ra>
